<compile_context>
chip_gen: v7x
topology: tpu7x:2x2x1
jax: 0.10.0
libtpu: 0.0.40
codegen_flags: <defaults>
</compile_context>

<pallas_src>
import functools
import math

import jax
import jax.numpy as jnp
from jax import lax
from jax.experimental import pallas as pl
from jax.experimental.pallas import tpu as pltpu  # noqa: F401  (TPU backend)


def _mha_kernel(q_ref, k_ref, v_ref, w_ref, b_ref, out_ref, attn_ref, *, num_heads):
    """Whole problem in one invocation.

    q_ref: (L, N, E), k_ref/v_ref: (S, N, E)
    w_ref: (4, E, E)  -> [Wq^T*scale, Wk^T, Wv^T, Wo^T]
    b_ref: (4, 1, E)  -> [bq*scale, bk, bv, bo]
    out_ref: (L, N, E), attn_ref: (N, L, S)
    """
    L, N, E = q_ref.shape
    S = k_ref.shape[0]
    H = num_heads
    hd = E // H

    # Batch-major merged-row views: one relayout per input, outside all loops.
    q2 = jnp.transpose(q_ref[...], (1, 0, 2)).reshape(N * L, E)
    k2 = jnp.transpose(k_ref[...], (1, 0, 2)).reshape(N * S, E)
    v2 = jnp.transpose(v_ref[...], (1, 0, 2)).reshape(N * S, E)

    # Full-width projections (1/sqrt(hd) scale already folded into Wq/bq).
    q_all = jnp.dot(q2, w_ref[0], preferred_element_type=jnp.float32) + b_ref[0]
    k_all = jnp.dot(k2, w_ref[1], preferred_element_type=jnp.float32) + b_ref[1]
    v_all = jnp.dot(v2, w_ref[2], preferred_element_type=jnp.float32) + b_ref[2]

    dn_t = (((1,), (1,)), ((), ()))  # contract last dims of both operands (x @ y.T)

    # Per-(n, h) score blocks (static contiguous slices), stacked for one softmax.
    score_blocks = []
    for n in range(N):
        qn = q_all[n * L:(n + 1) * L, :]
        kn = k_all[n * S:(n + 1) * S, :]
        for h in range(H):
            qnh = qn[:, h * hd:(h + 1) * hd]
            knh = kn[:, h * hd:(h + 1) * hd]
            score_blocks.append(
                lax.dot_general(qnh, knh, dn_t, preferred_element_type=jnp.float32))
    s_all = jnp.concatenate(score_blocks, axis=0)            # (N*H*L, S)

    # ONE fused, numerically-stable softmax over all (n, h, l) rows.
    m = jnp.max(s_all, axis=-1, keepdims=True)
    e = jnp.exp(s_all - m)
    denom = jnp.sum(e, axis=-1, keepdims=True)
    r = pl.reciprocal(denom, approx=True)                     # EUP vrcp
    r = r * (2.0 - denom * r)                                 # one Newton step
    p_all = e * r                                             # (N*H*L, S)

    # Context per (n, h); lane-pack heads -> ONE full-width output projection.
    ctx_rows = []
    attn_rows = []
    for n in range(N):
        vn = v_all[n * S:(n + 1) * S, :]
        ctx_h = []
        p_sum = None
        for h in range(H):
            base = (n * H + h) * L
            p = p_all[base:base + L, :]                       # (L, S)
            p_sum = p if p_sum is None else p_sum + p
            vnh = vn[:, h * hd:(h + 1) * hd]                  # (S, hd)
            ctx_h.append(jnp.dot(p, vnh, preferred_element_type=jnp.float32))
        ctx_rows.append(jnp.concatenate(ctx_h, axis=-1))      # (L, E), heads at h*hd
        attn_rows.append(p_sum * (1.0 / H))                   # (L, S)

    ctx_all = jnp.concatenate(ctx_rows, axis=0)               # (N*L, E)
    out_all = jnp.dot(ctx_all, w_ref[3],
                      preferred_element_type=jnp.float32) + b_ref[3]

    # Single dense stores, already in final layouts.
    out_ref[...] = jnp.transpose(out_all.reshape(N, L, E), (1, 0, 2)).astype(out_ref.dtype)
    attn_ref[...] = jnp.stack(attn_rows, axis=0).astype(attn_ref.dtype)   # (N, L, S)


def cross_attention_fmri_smri(query, key, value, packed_params, *, num_heads):
    """query: (L, N, E); key/value: (S, N, E). Returns (x_attend (L,N,E), attn (N,L,S))."""
    L, N, E = query.shape
    S = key.shape[0]
    w_all, b_all = packed_params

    kernel = functools.partial(_mha_kernel, num_heads=num_heads)
    out, attn = pl.pallas_call(
        kernel,
        out_shape=(jax.ShapeDtypeStruct((L, N, E), query.dtype),
                   jax.ShapeDtypeStruct((N, L, S), jnp.float32)),
    )(query, key, value, w_all, b_all)
    return out, attn


def make_params(key, input_dim):
    """Deterministic synthetic params with torch nn.MultiheadAttention layout."""
    E = input_dim
    k1, k2 = jax.random.split(key)
    in_proj_w = jax.random.normal(k1, (3 * E, E), jnp.float32) * (1.0 / math.sqrt(E))
    out_proj_w = jax.random.normal(k2, (E, E), jnp.float32) * (1.0 / math.sqrt(E))
    in_proj_b = jnp.linspace(-0.1, 0.1, 3 * E, dtype=jnp.float32)
    out_proj_b = jnp.linspace(-0.05, 0.05, E, dtype=jnp.float32)
    return in_proj_w, in_proj_b, out_proj_w, out_proj_b


def pack_params(raw_params, num_heads):
    """One-time packing: full-width (E,E) transposed weight slabs, scale folded into Wq/bq."""
    in_w, in_b, out_w, out_b = raw_params
    E = out_w.shape[0]
    hd = E // num_heads
    scale = 1.0 / math.sqrt(hd)

    wq, wk, wv = in_w[:E], in_w[E:2 * E], in_w[2 * E:]
    bq, bk, bv = in_b[:E], in_b[E:2 * E], in_b[2 * E:]

    w_all = jnp.stack([
        (wq * scale).T,     # x @ (Wq*scale)^T
        wk.T,
        wv.T,
        out_w.T,            # ctx @ Wo^T
    ], axis=0)              # (4, E, E)

    b_all = jnp.stack([
        (bq * scale).reshape(1, E),
        bk.reshape(1, E),
        bv.reshape(1, E),
        out_b.reshape(1, E),
    ], axis=0)              # (4, 1, E)

    return w_all, b_all


def reference_mha(query, key, value, raw_params, num_heads):
    """Pure-JAX reference mirroring torch.nn.MultiheadAttention (no dropout, avg weights)."""
    in_w, in_b, out_w, out_b = raw_params
    L, N, E = query.shape
    S = key.shape[0]
    H = num_heads
    hd = E // H
    wq, wk, wv = in_w[:E], in_w[E:2 * E], in_w[2 * E:]
    bq, bk, bv = in_b[:E], in_b[E:2 * E], in_b[2 * E:]

    q = jnp.einsum('lne,fe->lnf', query, wq) + bq
    k = jnp.einsum('sne,fe->snf', key, wk) + bk
    v = jnp.einsum('sne,fe->snf', value, wv) + bv
    qh = q.reshape(L, N, H, hd).transpose(1, 2, 0, 3)   # (N,H,L,hd)
    kh = k.reshape(S, N, H, hd).transpose(1, 2, 0, 3)
    vh = v.reshape(S, N, H, hd).transpose(1, 2, 0, 3)
    scores = jnp.einsum('nhld,nhsd->nhls', qh, kh) / math.sqrt(hd)
    p = jax.nn.softmax(scores, axis=-1)
    ctx = jnp.einsum('nhls,nhsd->nhld', p, vh)
    ctx = ctx.transpose(2, 0, 1, 3).reshape(L, N, E)
    out = jnp.einsum('lne,fe->lnf', ctx, out_w) + out_b
    return out, jnp.mean(p, axis=1)                      # (L,N,E), (N,L,S)


if __name__ == "__main__":
    L, S, N, E, H = 8, 8, 2, 32, 4   # tgt seq, src seq, batch, input_dim, num_heads

    root = jax.random.PRNGKey(0)
    kq, kk, kv, kp = jax.random.split(root, 4)
    query = jax.random.normal(kq, (L, N, E), jnp.float32)
    key = jax.random.normal(kk, (S, N, E), jnp.float32)
    value = jax.random.normal(kv, (S, N, E), jnp.float32)

    raw_params = make_params(kp, E)
    packed_params = pack_params(raw_params, H)

    x_attend, attn_matrix = cross_attention_fmri_smri(
        query, key, value, packed_params, num_heads=H)
    jax.block_until_ready((x_attend, attn_matrix))

    x_ref, a_ref = reference_mha(query, key, value, raw_params, H)
    assert x_attend.shape == (L, N, E) and attn_matrix.shape == (N, L, S)
    assert jnp.allclose(x_attend, x_ref, rtol=1e-4, atol=1e-4), \
        float(jnp.max(jnp.abs(x_attend - x_ref)))
    assert jnp.allclose(attn_matrix, a_ref, rtol=1e-4, atol=1e-4), \
        float(jnp.max(jnp.abs(attn_matrix - a_ref)))

    print("KERNEL_OK")
</pallas_src>

<mosaic_0001>
module attributes {stable_mosaic.version = 11 : i64} {
  func.func @_mha_kernel(%arg0: memref<8x2x32xf32, #tpu.memory_space<vmem>>, %arg1: memref<8x2x32xf32, #tpu.memory_space<vmem>>, %arg2: memref<8x2x32xf32, #tpu.memory_space<vmem>>, %arg3: memref<4x32x32xf32, #tpu.memory_space<vmem>>, %arg4: memref<4x1x32xf32, #tpu.memory_space<vmem>>, %arg5: memref<8x2x32xf32, #tpu.memory_space<vmem>>, %arg6: memref<2x8x8xf32, #tpu.memory_space<vmem>>) attributes {dimension_semantics = [], scalar_prefetch = 0 : i64, scratch_operands = 0 : i64, tpu.core_type = #tpu.core_type<tc>} {
    %c0 = arith.constant 0 : index
    %c0_0 = arith.constant 0 : index
    %c0_1 = arith.constant 0 : index
    %0 = vector.load %arg0[%c0, %c0_0, %c0_1] : memref<8x2x32xf32, #tpu.memory_space<vmem>>, vector<8x2x32xf32>
    %1 = tpu.transpose %0, [1, 0, 2] : vector<8x2x32xf32> -> vector<2x8x32xf32>
    %2 = vector.shape_cast %1 : vector<2x8x32xf32> to vector<16x32xf32>
    %c0_2 = arith.constant 0 : index
    %c0_3 = arith.constant 0 : index
    %c0_4 = arith.constant 0 : index
    %3 = vector.load %arg1[%c0_2, %c0_3, %c0_4] : memref<8x2x32xf32, #tpu.memory_space<vmem>>, vector<8x2x32xf32>
    %4 = tpu.transpose %3, [1, 0, 2] : vector<8x2x32xf32> -> vector<2x8x32xf32>
    %5 = vector.shape_cast %4 : vector<2x8x32xf32> to vector<16x32xf32>
    %c0_5 = arith.constant 0 : index
    %c0_6 = arith.constant 0 : index
    %c0_7 = arith.constant 0 : index
    %6 = vector.load %arg2[%c0_5, %c0_6, %c0_7] : memref<8x2x32xf32, #tpu.memory_space<vmem>>, vector<8x2x32xf32>
    %7 = tpu.transpose %6, [1, 0, 2] : vector<8x2x32xf32> -> vector<2x8x32xf32>
    %8 = vector.shape_cast %7 : vector<2x8x32xf32> to vector<16x32xf32>
    %c0_8 = arith.constant 0 : index
    %c0_9 = arith.constant 0 : index
    %c0_10 = arith.constant 0 : index
    %9 = vector.load %arg3[%c0_8, %c0_9, %c0_10] : memref<4x32x32xf32, #tpu.memory_space<vmem>>, vector<1x32x32xf32>
    %10 = vector.shape_cast %9 : vector<1x32x32xf32> to vector<32x32xf32>
    %cst = arith.constant dense<0.000000e+00> : vector<16x32xf32>
    %11 = tpu.matmul %2, %10, %cst {dimension_numbers = #tpu.dot_dimension_numbers<[1], [0], [0], [1], [0, 0, 1, 1], [], []>} : vector<16x32xf32>, vector<32x32xf32>, vector<16x32xf32> -> vector<16x32xf32>
    %c0_11 = arith.constant 0 : index
    %c0_12 = arith.constant 0 : index
    %c0_13 = arith.constant 0 : index
    %12 = vector.load %arg4[%c0_11, %c0_12, %c0_13] : memref<4x1x32xf32, #tpu.memory_space<vmem>>, vector<1x1x32xf32>
    %13 = vector.shape_cast %12 : vector<1x1x32xf32> to vector<1x32xf32>
    %14 = vector.broadcast %13 : vector<1x32xf32> to vector<16x32xf32>
    %15 = arith.addf %11, %14 : vector<16x32xf32>
    %c1 = arith.constant 1 : index
    %c0_14 = arith.constant 0 : index
    %c0_15 = arith.constant 0 : index
    %16 = vector.load %arg3[%c1, %c0_14, %c0_15] : memref<4x32x32xf32, #tpu.memory_space<vmem>>, vector<1x32x32xf32>
    %17 = vector.shape_cast %16 : vector<1x32x32xf32> to vector<32x32xf32>
    %cst_16 = arith.constant dense<0.000000e+00> : vector<16x32xf32>
    %18 = tpu.matmul %5, %17, %cst_16 {dimension_numbers = #tpu.dot_dimension_numbers<[1], [0], [0], [1], [0, 0, 1, 1], [], []>} : vector<16x32xf32>, vector<32x32xf32>, vector<16x32xf32> -> vector<16x32xf32>
    %c1_17 = arith.constant 1 : index
    %c0_18 = arith.constant 0 : index
    %c0_19 = arith.constant 0 : index
    %19 = vector.load %arg4[%c1_17, %c0_18, %c0_19] : memref<4x1x32xf32, #tpu.memory_space<vmem>>, vector<1x1x32xf32>
    %20 = vector.shape_cast %19 : vector<1x1x32xf32> to vector<1x32xf32>
    %21 = vector.broadcast %20 : vector<1x32xf32> to vector<16x32xf32>
    %22 = arith.addf %18, %21 : vector<16x32xf32>
    %c2 = arith.constant 2 : index
    %c0_20 = arith.constant 0 : index
    %c0_21 = arith.constant 0 : index
    %23 = vector.load %arg3[%c2, %c0_20, %c0_21] : memref<4x32x32xf32, #tpu.memory_space<vmem>>, vector<1x32x32xf32>
    %24 = vector.shape_cast %23 : vector<1x32x32xf32> to vector<32x32xf32>
    %cst_22 = arith.constant dense<0.000000e+00> : vector<16x32xf32>
    %25 = tpu.matmul %8, %24, %cst_22 {dimension_numbers = #tpu.dot_dimension_numbers<[1], [0], [0], [1], [0, 0, 1, 1], [], []>} : vector<16x32xf32>, vector<32x32xf32>, vector<16x32xf32> -> vector<16x32xf32>
    %c2_23 = arith.constant 2 : index
    %c0_24 = arith.constant 0 : index
    %c0_25 = arith.constant 0 : index
    %26 = vector.load %arg4[%c2_23, %c0_24, %c0_25] : memref<4x1x32xf32, #tpu.memory_space<vmem>>, vector<1x1x32xf32>
    %27 = vector.shape_cast %26 : vector<1x1x32xf32> to vector<1x32xf32>
    %28 = vector.broadcast %27 : vector<1x32xf32> to vector<16x32xf32>
    %29 = arith.addf %25, %28 : vector<16x32xf32>
    %30 = vector.extract_strided_slice %15 {offsets = [0, 0], sizes = [8, 32], strides = [1, 1]} : vector<16x32xf32> to vector<8x32xf32>
    %31 = vector.extract_strided_slice %22 {offsets = [0, 0], sizes = [8, 32], strides = [1, 1]} : vector<16x32xf32> to vector<8x32xf32>
    %32 = vector.extract_strided_slice %30 {offsets = [0, 0], sizes = [8, 8], strides = [1, 1]} : vector<8x32xf32> to vector<8x8xf32>
    %33 = vector.extract_strided_slice %31 {offsets = [0, 0], sizes = [8, 8], strides = [1, 1]} : vector<8x32xf32> to vector<8x8xf32>
    %cst_26 = arith.constant dense<0.000000e+00> : vector<8x8xf32>
    %34 = tpu.matmul %32, %33, %cst_26 {dimension_numbers = #tpu.dot_dimension_numbers<[1], [1], [0], [0], [0, 0, 1, 0], [], []>} : vector<8x8xf32>, vector<8x8xf32>, vector<8x8xf32> -> vector<8x8xf32>
    %35 = vector.extract_strided_slice %30 {offsets = [0, 8], sizes = [8, 8], strides = [1, 1]} : vector<8x32xf32> to vector<8x8xf32>
    %36 = vector.extract_strided_slice %31 {offsets = [0, 8], sizes = [8, 8], strides = [1, 1]} : vector<8x32xf32> to vector<8x8xf32>
    %cst_27 = arith.constant dense<0.000000e+00> : vector<8x8xf32>
    %37 = tpu.matmul %35, %36, %cst_27 {dimension_numbers = #tpu.dot_dimension_numbers<[1], [1], [0], [0], [0, 0, 1, 0], [], []>} : vector<8x8xf32>, vector<8x8xf32>, vector<8x8xf32> -> vector<8x8xf32>
    %38 = vector.extract_strided_slice %30 {offsets = [0, 16], sizes = [8, 8], strides = [1, 1]} : vector<8x32xf32> to vector<8x8xf32>
    %39 = vector.extract_strided_slice %31 {offsets = [0, 16], sizes = [8, 8], strides = [1, 1]} : vector<8x32xf32> to vector<8x8xf32>
    %cst_28 = arith.constant dense<0.000000e+00> : vector<8x8xf32>
    %40 = tpu.matmul %38, %39, %cst_28 {dimension_numbers = #tpu.dot_dimension_numbers<[1], [1], [0], [0], [0, 0, 1, 0], [], []>} : vector<8x8xf32>, vector<8x8xf32>, vector<8x8xf32> -> vector<8x8xf32>
    %41 = vector.extract_strided_slice %30 {offsets = [0, 24], sizes = [8, 8], strides = [1, 1]} : vector<8x32xf32> to vector<8x8xf32>
    %42 = vector.extract_strided_slice %31 {offsets = [0, 24], sizes = [8, 8], strides = [1, 1]} : vector<8x32xf32> to vector<8x8xf32>
    %cst_29 = arith.constant dense<0.000000e+00> : vector<8x8xf32>
    %43 = tpu.matmul %41, %42, %cst_29 {dimension_numbers = #tpu.dot_dimension_numbers<[1], [1], [0], [0], [0, 0, 1, 0], [], []>} : vector<8x8xf32>, vector<8x8xf32>, vector<8x8xf32> -> vector<8x8xf32>
    %44 = vector.extract_strided_slice %15 {offsets = [8, 0], sizes = [8, 32], strides = [1, 1]} : vector<16x32xf32> to vector<8x32xf32>
    %45 = vector.extract_strided_slice %22 {offsets = [8, 0], sizes = [8, 32], strides = [1, 1]} : vector<16x32xf32> to vector<8x32xf32>
    %46 = vector.extract_strided_slice %44 {offsets = [0, 0], sizes = [8, 8], strides = [1, 1]} : vector<8x32xf32> to vector<8x8xf32>
    %47 = vector.extract_strided_slice %45 {offsets = [0, 0], sizes = [8, 8], strides = [1, 1]} : vector<8x32xf32> to vector<8x8xf32>
    %cst_30 = arith.constant dense<0.000000e+00> : vector<8x8xf32>
    %48 = tpu.matmul %46, %47, %cst_30 {dimension_numbers = #tpu.dot_dimension_numbers<[1], [1], [0], [0], [0, 0, 1, 0], [], []>} : vector<8x8xf32>, vector<8x8xf32>, vector<8x8xf32> -> vector<8x8xf32>
    %49 = vector.extract_strided_slice %44 {offsets = [0, 8], sizes = [8, 8], strides = [1, 1]} : vector<8x32xf32> to vector<8x8xf32>
    %50 = vector.extract_strided_slice %45 {offsets = [0, 8], sizes = [8, 8], strides = [1, 1]} : vector<8x32xf32> to vector<8x8xf32>
    %cst_31 = arith.constant dense<0.000000e+00> : vector<8x8xf32>
    %51 = tpu.matmul %49, %50, %cst_31 {dimension_numbers = #tpu.dot_dimension_numbers<[1], [1], [0], [0], [0, 0, 1, 0], [], []>} : vector<8x8xf32>, vector<8x8xf32>, vector<8x8xf32> -> vector<8x8xf32>
    %52 = vector.extract_strided_slice %44 {offsets = [0, 16], sizes = [8, 8], strides = [1, 1]} : vector<8x32xf32> to vector<8x8xf32>
    %53 = vector.extract_strided_slice %45 {offsets = [0, 16], sizes = [8, 8], strides = [1, 1]} : vector<8x32xf32> to vector<8x8xf32>
    %cst_32 = arith.constant dense<0.000000e+00> : vector<8x8xf32>
    %54 = tpu.matmul %52, %53, %cst_32 {dimension_numbers = #tpu.dot_dimension_numbers<[1], [1], [0], [0], [0, 0, 1, 0], [], []>} : vector<8x8xf32>, vector<8x8xf32>, vector<8x8xf32> -> vector<8x8xf32>
    %55 = vector.extract_strided_slice %44 {offsets = [0, 24], sizes = [8, 8], strides = [1, 1]} : vector<8x32xf32> to vector<8x8xf32>
    %56 = vector.extract_strided_slice %45 {offsets = [0, 24], sizes = [8, 8], strides = [1, 1]} : vector<8x32xf32> to vector<8x8xf32>
    %cst_33 = arith.constant dense<0.000000e+00> : vector<8x8xf32>
    %57 = tpu.matmul %55, %56, %cst_33 {dimension_numbers = #tpu.dot_dimension_numbers<[1], [1], [0], [0], [0, 0, 1, 0], [], []>} : vector<8x8xf32>, vector<8x8xf32>, vector<8x8xf32> -> vector<8x8xf32>
    %58 = tpu.concatenate %34, %37, %40, %43, %48, %51, %54, %57 in 0 : vector<8x8xf32>, vector<8x8xf32>, vector<8x8xf32>, vector<8x8xf32>, vector<8x8xf32>, vector<8x8xf32>, vector<8x8xf32>, vector<8x8xf32> -> vector<64x8xf32>
    %cst_34 = arith.constant dense<0xFF800000> : vector<64xf32>
    %59 = vector.multi_reduction <maximumf>, %58, %cst_34 [1] : vector<64x8xf32> to vector<64xf32>
    %60 = vector.shape_cast %59 : vector<64xf32> to vector<64x1xf32>
    %61 = vector.broadcast %60 : vector<64x1xf32> to vector<64x8xf32>
    %62 = arith.subf %58, %61 : vector<64x8xf32>
    %63 = math.exp %62 : vector<64x8xf32>
    %cst_35 = arith.constant dense<0.000000e+00> : vector<64xf32>
    %64 = vector.multi_reduction <add>, %63, %cst_35 [1] : vector<64x8xf32> to vector<64xf32>
    %65 = vector.shape_cast %64 : vector<64xf32> to vector<64x1xf32>
    %66 = tpu.reciprocal %65 {approx = true} : vector<64x1xf32> -> vector<64x1xf32>
    %67 = arith.mulf %65, %66 : vector<64x1xf32>
    %cst_36 = arith.constant 2.000000e+00 : f32
    %68 = vector.broadcast %cst_36 : f32 to vector<64x1xf32>
    %69 = arith.subf %68, %67 : vector<64x1xf32>
    %70 = arith.mulf %66, %69 : vector<64x1xf32>
    %71 = vector.broadcast %70 : vector<64x1xf32> to vector<64x8xf32>
    %72 = arith.mulf %63, %71 : vector<64x8xf32>
    %73 = vector.extract_strided_slice %29 {offsets = [0, 0], sizes = [8, 32], strides = [1, 1]} : vector<16x32xf32> to vector<8x32xf32>
    %74 = vector.extract_strided_slice %72 {offsets = [0, 0], sizes = [8, 8], strides = [1, 1]} : vector<64x8xf32> to vector<8x8xf32>
    %75 = vector.extract_strided_slice %73 {offsets = [0, 0], sizes = [8, 8], strides = [1, 1]} : vector<8x32xf32> to vector<8x8xf32>
    %cst_37 = arith.constant dense<0.000000e+00> : vector<8x8xf32>
    %76 = tpu.matmul %74, %75, %cst_37 {dimension_numbers = #tpu.dot_dimension_numbers<[1], [0], [0], [1], [0, 0, 1, 1], [], []>} : vector<8x8xf32>, vector<8x8xf32>, vector<8x8xf32> -> vector<8x8xf32>
    %77 = vector.extract_strided_slice %72 {offsets = [8, 0], sizes = [8, 8], strides = [1, 1]} : vector<64x8xf32> to vector<8x8xf32>
    %78 = arith.addf %74, %77 : vector<8x8xf32>
    %79 = vector.extract_strided_slice %73 {offsets = [0, 8], sizes = [8, 8], strides = [1, 1]} : vector<8x32xf32> to vector<8x8xf32>
    %cst_38 = arith.constant dense<0.000000e+00> : vector<8x8xf32>
    %80 = tpu.matmul %77, %79, %cst_38 {dimension_numbers = #tpu.dot_dimension_numbers<[1], [0], [0], [1], [0, 0, 1, 1], [], []>} : vector<8x8xf32>, vector<8x8xf32>, vector<8x8xf32> -> vector<8x8xf32>
    %81 = vector.extract_strided_slice %72 {offsets = [16, 0], sizes = [8, 8], strides = [1, 1]} : vector<64x8xf32> to vector<8x8xf32>
    %82 = arith.addf %78, %81 : vector<8x8xf32>
    %83 = vector.extract_strided_slice %73 {offsets = [0, 16], sizes = [8, 8], strides = [1, 1]} : vector<8x32xf32> to vector<8x8xf32>
    %cst_39 = arith.constant dense<0.000000e+00> : vector<8x8xf32>
    %84 = tpu.matmul %81, %83, %cst_39 {dimension_numbers = #tpu.dot_dimension_numbers<[1], [0], [0], [1], [0, 0, 1, 1], [], []>} : vector<8x8xf32>, vector<8x8xf32>, vector<8x8xf32> -> vector<8x8xf32>
    %85 = vector.extract_strided_slice %72 {offsets = [24, 0], sizes = [8, 8], strides = [1, 1]} : vector<64x8xf32> to vector<8x8xf32>
    %86 = arith.addf %82, %85 : vector<8x8xf32>
    %87 = vector.extract_strided_slice %73 {offsets = [0, 24], sizes = [8, 8], strides = [1, 1]} : vector<8x32xf32> to vector<8x8xf32>
    %cst_40 = arith.constant dense<0.000000e+00> : vector<8x8xf32>
    %88 = tpu.matmul %85, %87, %cst_40 {dimension_numbers = #tpu.dot_dimension_numbers<[1], [0], [0], [1], [0, 0, 1, 1], [], []>} : vector<8x8xf32>, vector<8x8xf32>, vector<8x8xf32> -> vector<8x8xf32>
    %89 = tpu.concatenate %76, %80, %84, %88 in 1 : vector<8x8xf32>, vector<8x8xf32>, vector<8x8xf32>, vector<8x8xf32> -> vector<8x32xf32>
    %cst_41 = arith.constant 2.500000e-01 : f32
    %90 = vector.broadcast %cst_41 : f32 to vector<8x8xf32>
    %91 = arith.mulf %86, %90 : vector<8x8xf32>
    %92 = vector.extract_strided_slice %29 {offsets = [8, 0], sizes = [8, 32], strides = [1, 1]} : vector<16x32xf32> to vector<8x32xf32>
    %93 = vector.extract_strided_slice %72 {offsets = [32, 0], sizes = [8, 8], strides = [1, 1]} : vector<64x8xf32> to vector<8x8xf32>
    %94 = vector.extract_strided_slice %92 {offsets = [0, 0], sizes = [8, 8], strides = [1, 1]} : vector<8x32xf32> to vector<8x8xf32>
    %cst_42 = arith.constant dense<0.000000e+00> : vector<8x8xf32>
    %95 = tpu.matmul %93, %94, %cst_42 {dimension_numbers = #tpu.dot_dimension_numbers<[1], [0], [0], [1], [0, 0, 1, 1], [], []>} : vector<8x8xf32>, vector<8x8xf32>, vector<8x8xf32> -> vector<8x8xf32>
    %96 = vector.extract_strided_slice %72 {offsets = [40, 0], sizes = [8, 8], strides = [1, 1]} : vector<64x8xf32> to vector<8x8xf32>
    %97 = arith.addf %93, %96 : vector<8x8xf32>
    %98 = vector.extract_strided_slice %92 {offsets = [0, 8], sizes = [8, 8], strides = [1, 1]} : vector<8x32xf32> to vector<8x8xf32>
    %cst_43 = arith.constant dense<0.000000e+00> : vector<8x8xf32>
    %99 = tpu.matmul %96, %98, %cst_43 {dimension_numbers = #tpu.dot_dimension_numbers<[1], [0], [0], [1], [0, 0, 1, 1], [], []>} : vector<8x8xf32>, vector<8x8xf32>, vector<8x8xf32> -> vector<8x8xf32>
    %100 = vector.extract_strided_slice %72 {offsets = [48, 0], sizes = [8, 8], strides = [1, 1]} : vector<64x8xf32> to vector<8x8xf32>
    %101 = arith.addf %97, %100 : vector<8x8xf32>
    %102 = vector.extract_strided_slice %92 {offsets = [0, 16], sizes = [8, 8], strides = [1, 1]} : vector<8x32xf32> to vector<8x8xf32>
    %cst_44 = arith.constant dense<0.000000e+00> : vector<8x8xf32>
    %103 = tpu.matmul %100, %102, %cst_44 {dimension_numbers = #tpu.dot_dimension_numbers<[1], [0], [0], [1], [0, 0, 1, 1], [], []>} : vector<8x8xf32>, vector<8x8xf32>, vector<8x8xf32> -> vector<8x8xf32>
    %104 = vector.extract_strided_slice %72 {offsets = [56, 0], sizes = [8, 8], strides = [1, 1]} : vector<64x8xf32> to vector<8x8xf32>
    %105 = arith.addf %101, %104 : vector<8x8xf32>
    %106 = vector.extract_strided_slice %92 {offsets = [0, 24], sizes = [8, 8], strides = [1, 1]} : vector<8x32xf32> to vector<8x8xf32>
    %cst_45 = arith.constant dense<0.000000e+00> : vector<8x8xf32>
    %107 = tpu.matmul %104, %106, %cst_45 {dimension_numbers = #tpu.dot_dimension_numbers<[1], [0], [0], [1], [0, 0, 1, 1], [], []>} : vector<8x8xf32>, vector<8x8xf32>, vector<8x8xf32> -> vector<8x8xf32>
    %108 = tpu.concatenate %95, %99, %103, %107 in 1 : vector<8x8xf32>, vector<8x8xf32>, vector<8x8xf32>, vector<8x8xf32> -> vector<8x32xf32>
    %cst_46 = arith.constant 2.500000e-01 : f32
    %109 = vector.broadcast %cst_46 : f32 to vector<8x8xf32>
    %110 = arith.mulf %105, %109 : vector<8x8xf32>
    %111 = tpu.concatenate %89, %108 in 0 : vector<8x32xf32>, vector<8x32xf32> -> vector<16x32xf32>
    %c3 = arith.constant 3 : index
    %c0_47 = arith.constant 0 : index
    %c0_48 = arith.constant 0 : index
    %112 = vector.load %arg3[%c3, %c0_47, %c0_48] : memref<4x32x32xf32, #tpu.memory_space<vmem>>, vector<1x32x32xf32>
    %113 = vector.shape_cast %112 : vector<1x32x32xf32> to vector<32x32xf32>
    %cst_49 = arith.constant dense<0.000000e+00> : vector<16x32xf32>
    %114 = tpu.matmul %111, %113, %cst_49 {dimension_numbers = #tpu.dot_dimension_numbers<[1], [0], [0], [1], [0, 0, 1, 1], [], []>} : vector<16x32xf32>, vector<32x32xf32>, vector<16x32xf32> -> vector<16x32xf32>
    %c3_50 = arith.constant 3 : index
    %c0_51 = arith.constant 0 : index
    %c0_52 = arith.constant 0 : index
    %115 = vector.load %arg4[%c3_50, %c0_51, %c0_52] : memref<4x1x32xf32, #tpu.memory_space<vmem>>, vector<1x1x32xf32>
    %116 = vector.shape_cast %115 : vector<1x1x32xf32> to vector<1x32xf32>
    %117 = vector.broadcast %116 : vector<1x32xf32> to vector<16x32xf32>
    %118 = arith.addf %114, %117 : vector<16x32xf32>
    %119 = vector.shape_cast %118 : vector<16x32xf32> to vector<2x8x32xf32>
    %120 = tpu.transpose %119, [1, 0, 2] : vector<2x8x32xf32> -> vector<8x2x32xf32>
    %c0_53 = arith.constant 0 : index
    %c0_54 = arith.constant 0 : index
    %c0_55 = arith.constant 0 : index
    %121 = vector.load %arg5[%c0_53, %c0_54, %c0_55] : memref<8x2x32xf32, #tpu.memory_space<vmem>>, vector<8x2x32xf32>
    tpu.vector_store %arg5[%c0_53, %c0_54, %c0_55], %120 {strides = array<i32>} : memref<8x2x32xf32, #tpu.memory_space<vmem>>, vector<8x2x32xf32>,
    %122 = vector.shape_cast %91 : vector<8x8xf32> to vector<1x8x8xf32>
    %123 = vector.shape_cast %110 : vector<8x8xf32> to vector<1x8x8xf32>
    %124 = tpu.concatenate %122, %123 in 0 : vector<1x8x8xf32>, vector<1x8x8xf32> -> vector<2x8x8xf32>
    %c0_56 = arith.constant 0 : index
    %c0_57 = arith.constant 0 : index
    %c0_58 = arith.constant 0 : index
    %125 = vector.load %arg6[%c0_56, %c0_57, %c0_58] : memref<2x8x8xf32, #tpu.memory_space<vmem>>, vector<2x8x8xf32>
    tpu.vector_store %arg6[%c0_56, %c0_57, %c0_58], %124 {strides = array<i32>} : memref<2x8x8xf32, #tpu.memory_space<vmem>>, vector<2x8x8xf32>,
    return
  }
}

</mosaic_0001>

<bundles_post_ra>
// kernel: tpu_custom_call.1
= control target key start
LH: loop header
LB: loop body
LE: loop exit
PB: predicated region body
PF: predicated region fallthrough
CT: control target
= control target key end

     0   :  { %12 = vsyncpa [#allocation3], 0  ;;  %s2951_s0 = inlined_call_operand.hbm [shape: f32[8,2,32], index: 0, kind: input, shape index: {}]   ;;  %s2952_s1 = inlined_call_operand.hbm [shape: f32[8,2,32], index: 1, kind: input, shape index: {}]   ;;  %s2953_s2 = inlined_call_operand.hbm [shape: f32[8,2,32], index: 2, kind: input, shape index: {}]   ;;  %s2954_s3 = inlined_call_operand.hbm [shape: f32[4,32,32], index: 3, kind: input, shape index: {}]   ;;  %s2955_s4 = inlined_call_operand.vmem [shape: f32[4,1,32], index: 4, kind: input, shape index: {}]   ;;  %s2956_s5 = inlined_call_operand.hbm [shape: f32[8,2,32], index: 5, kind: output, shape index: {0}]   ;;  %s2957_s6 = inlined_call_operand.hbm [shape: f32[2,8,8], index: 6, kind: output, shape index: {1}]  }
   0x1   :  { %13 = vsyncpa [#allocation6], 0 }
   0x2   :  { %14 = vsyncpa [#allocation9], 0 }
   0x3   :  { %15 = vsyncpa [#allocation4], 0 }
   0x4   :  { %16 = vsyncpa [#allocation12], 0  ;;  %s2585_s21 = smov [#allocation5]   ;;  %s2586_s23 = smov [#allocation2]  }
   0x5   :  { %s34_s22 = sshll.u32 %s2585_s21, 4  ;;  %s22_s24 = sshll.u32 %s2586_s23, 4  ;;  %s35_s22 = int_to_ptr.vmem [resolvable:$true] %s34_s22  ;;  %s2639_s24 = int_to_ptr.vmem [resolvable:$true] %s22_s24 }
   0x6   :  { %s2443_s27 = scalar_lea.hbm %s2952_s1, 256 }
   0x7   :  { %p2444_p0 = scmp.ne.s32.totalorder %s2952_s1, %s2443_s27  ;;  %p2447_p1 = scmp.lt.u32.totalorder %s2443_s27, %s2952_s1 }
   0x9   :  { %p2449_p2 = pnand %p2447_p1, %p2444_p0 }
   0xb   :  { %2452 = shalt.err (!%p2449_p2)
}
   0xc   :  { %s2453_s8 = scalar_lea.vmem %s35_s22, 256  ;;  %p2458_p4 = scmp.lt.s32.totalorder %s35_s22, %s35_s22 }
   0xd   :  { %p2454_p3 = scmp.ne.s32.totalorder %s35_s22, %s2453_s8  ;;  %p2459_p5 = scmp.lt.s32.totalorder %s2453_s8, %s2453_s8 }
   0xf   :  { %p2460_p6 = por %p2459_p5, %p2458_p4 }
  0x11   :  { %p2461_p7 = pnand %p2460_p6, %p2454_p3 }
  0x13   :  { %2464 = shalt.err (!%p2461_p7)
}
  0x14   :  { %s2587_s9 = smov 32   ;;  %s2588_s10 = smov 2  }
  0x15   :  { %40 = dma.hbm_to_vmem [thread:$0]  %s2952_s1, 256, %s35_s22, [#allocation6], %s2587_s9, %s2587_s9, %s2588_s10  }
  0x16   :  { %s2465_s15 = scalar_lea.hbm %s2951_s0, 256 }
  0x17   :  { %p2466_p8 = scmp.ne.s32.totalorder %s2951_s0, %s2465_s15  ;;  %p2469_p9 = scmp.lt.u32.totalorder %s2465_s15, %s2951_s0 }
  0x19   :  { %p2471_p10 = pnand %p2469_p9, %p2466_p8 }
  0x1b   :  { %2474 = shalt.err (!%p2471_p10)
}
  0x1c   :  { %s2475_s20 = scalar_lea.vmem %s2639_s24, 256  ;;  %p2480_p12 = scmp.lt.s32.totalorder %s2639_s24, %s2639_s24 }
  0x1d   :  { %p2476_p11 = scmp.ne.s32.totalorder %s2639_s24, %s2475_s20  ;;  %p2481_p13 = scmp.lt.s32.totalorder %s2475_s20, %s2475_s20 }
  0x1f   :  { %p2482_p0 = por %p2481_p13, %p2480_p12 }
  0x21   :  { %p2483_p1 = pnand %p2482_p0, %p2476_p11 }
  0x23   :  { %2486 = shalt.err (!%p2483_p1)
}
  0x24   :  { %28 = dma.hbm_to_vmem [thread:$0]  %s2951_s0, 256, %s2639_s24, [#allocation3], %s2587_s9, %s2587_s9, %s2588_s10  }
  0x25   :  { %s2589_s22 = smov [#allocation7]   ;;  %s2590_s25 = smov [#allocation8]  }
  0x26   :  { %s46_s23 = sshll.u32 %s2589_s22, 4  ;;  %s58_s26 = sshll.u32 %s2590_s25, 4  ;;  %s47_s23 = int_to_ptr.vmem [resolvable:$true] %s46_s23  ;;  %s2676_s26 = int_to_ptr.vmem [resolvable:$true] %s58_s26 }
  0x27   :  { %s2487_s29 = scalar_lea.hbm %s2953_s2, 256 }
  0x28   :  { %p2488_p2 = scmp.ne.s32.totalorder %s2953_s2, %s2487_s29  ;;  %p2491_p3 = scmp.lt.u32.totalorder %s2487_s29, %s2953_s2 }
  0x2a   :  { %p2493_p4 = pnand %p2491_p3, %p2488_p2 }
  0x2c   :  { %2496 = shalt.err (!%p2493_p4)
}
  0x2d   :  { %s2497_s0 = scalar_lea.vmem %s47_s23, 256  ;;  %p2502_p6 = scmp.lt.s32.totalorder %s47_s23, %s47_s23 }
  0x2e   :  { %p2498_p5 = scmp.ne.s32.totalorder %s47_s23, %s2497_s0  ;;  %p2503_p7 = scmp.lt.s32.totalorder %s2497_s0, %s2497_s0 }
  0x30   :  { %p2504_p8 = por %p2503_p7, %p2502_p6 }
  0x32   :  { %p2505_p9 = pnand %p2504_p8, %p2498_p5 }
  0x34   :  { %2508 = shalt.err (!%p2505_p9)
}
  0x35   :  { %52 = dma.hbm_to_vmem [thread:$0]  %s2953_s2, 256, %s47_s23, [#allocation6], %s2587_s9, %s2587_s9, %s2588_s10  }
  0x36   :  { %s2509_s15 = scalar_lea.hbm %s2954_s3, 2048 }
  0x37   :  { %p2510_p10 = scmp.ne.s32.totalorder %s2954_s3, %s2509_s15  ;;  %p2513_p11 = scmp.lt.u32.totalorder %s2509_s15, %s2954_s3 }
  0x39   :  { %p2515_p12 = pnand %p2513_p11, %p2510_p10 }
  0x3b   :  { %2518 = shalt.err (!%p2515_p12)
}
  0x3c   :  { %s2519_s20 = scalar_lea.vmem %s2676_s26, 2048  ;;  %p2524_p0 = scmp.lt.s32.totalorder %s2676_s26, %s2676_s26 }
  0x3d   :  { %p2520_p13 = scmp.ne.s32.totalorder %s2676_s26, %s2519_s20  ;;  %p2525_p1 = scmp.lt.s32.totalorder %s2519_s20, %s2519_s20 }
  0x3f   :  { %p2526_p2 = por %p2525_p1, %p2524_p0 }
  0x41   :  { %p2527_p3 = pnand %p2526_p2, %p2520_p13 }
  0x43   :  { %2530 = shalt.err (!%p2527_p3)
}
  0x44   :  { %s2591_s2 = smov 128   ;;  %s2592_s1 = smov 8  }
  0x45   :  { %64 = dma.hbm_to_vmem [thread:$0]  %s2954_s3, 2048, %s2676_s26, [#allocation9], %s2591_s2, %s2591_s2, %s2592_s1  }
  0x46   :  { %2575 = dma.done.wait [#allocation3], 256  }
  0x47   :  { %2576 = vsyncadd [#allocation3], 4294967040 }
  0x48   :  { %2577 = dma.done.wait [#allocation6], 512  }
  0x49   :  { %2578 = vsyncadd [#allocation6], 4294966784 }
  0x4a   :  { %2579 = dma.done.wait [#allocation9], 2048  }
  0x4b   :  { %2580 = vsyncadd [#allocation9], 4294965248  ;;  %v2593_v0 = vmov 1983009808   ;;  %v91_v2 = vlaneseq  ;;  %v2594_v5 = vmov 1934713408  }
  0x4c   :  { %v89_v1 = vunpack.c.l.s4 %v2593_v0  ;;  %v121_v6 = vunpack.c.l.s4 %v2594_v5  ;;  %v347_v7 = vld [vmem:[#allocation8 + $0x20] sm:$0xff]  ;;  %v348_v8 = vld [vmem:[#allocation8 + $0x28] sm:$0xff]  ;;  %v349_v12 = vld [vmem:[#allocation8 + $0x30] sm:$0xff]  ;;  %vm264_vm0 = vcmask 261120   ;;  %v2595_v58 = vmov 0.0   ;;  %s2597_s27 = smov 112  }
  0x4d   :  { %v92_v4 = vshrl.u32 %v91_v2, 7  ;;  %v253_v9 = vld [vmem:[#allocation8] sm:$0xff]  ;;  %v2344_v10 = vpack.c.bf16 %v348_v8, %v347_v7  ;;  %v254_v11 = vld [vmem:[#allocation8 + $0x8] sm:$0xff]  ;;  %v350_v13 = vld [vmem:[#allocation8 + $0x38] sm:$0xff]  ;;  %vm2596_vm1 = vmmov 0   ;;  %vm534_vm2 = vcmask 64512  }
  0x4e   :  { %v90_v3 = vunpack.c.0.s8 %v89_v1  ;;  %v2336_v14 = vpack.c.bf16 %v254_v11, %v253_v9  ;;  %v2348_v15 = vpack.c.bf16 %v350_v13, %v349_v12  ;;  %v255_v16 = vld [vmem:[#allocation8 + $0x10] sm:$0xff]  ;;  %v256_v17 = vld [vmem:[#allocation8 + $0x18] sm:$0xff]  ;;  %v122_v20 = vunpack.c.0.s8 %v121_v6  ;;  %v2431_v21 = vld.sshfl [vmem:[#allocation5] sm:$0xf pattern:$0x76325410] }
  0x4f   :  { %2345 = vmatprep.subr.bf16.mxu1 %v2344_v10  ;;  %v2340_v18 = vpack.c.bf16 %v256_v17, %v255_v16  ;;  %v2432_v22 = vld.sshfl [vmem:[#allocation5 + $0x2] sm:$0xf pattern:$0x76325410]  ;;  %v442_v34 = vld [vmem:[#allocation8 + $0x48] sm:$0xff]  ;;  %v443_v43 = vld [vmem:[#allocation8 + $0x50] sm:$0xff] }
  0x50   :  { %v2713_v19 = vsub.s32 %v90_v3, %v92_v4  ;;  %2347 = vmatpush3.bf16.msra.mxu1 %v2344_v10  ;;  %2337 = vmatprep.subr.bf16.mxu0 %v2336_v14  ;;  %v2433_v23 = vld.sshfl [vmem:[#allocation5 + $0x8] sm:$0xf pattern:$0x76325410]  ;;  %v2715_v25 = vsub.s32 %v122_v20, %v92_v4  ;;  %v177_v26 = vcombine.low %v2431_v21, %v2432_v22  ;;  %v441_v32 = vld [vmem:[#allocation8 + $0x40] sm:$0xff]  ;;  %v444_v44 = vld [vmem:[#allocation8 + $0x58] sm:$0xff] }
  0x51   :  { %2339 = vmatpush3.bf16.msra.mxu0 %v2336_v14  ;;  %2349 = vmatprep.subr.bf16.mxu1 %v2348_v15  ;;  %v2434_v24 = vld.sshfl [vmem:[#allocation5 + $0xa] sm:$0xf pattern:$0x76325410]  ;;  %v2352_v36 = vpack.c.bf16 %v442_v34, %v441_v32  ;;  %v2356_v47 = vpack.c.bf16 %v444_v44, %v443_v43  ;;  %v2121_v59 = vld [vmem:[%s2955_s4 + $0x1] ss:$0 sm:$0xff] }
  0x52   :  { %2341 = vmatprep.subr.bf16.mxu0 %v2340_v18  ;;  %v2435_v27 = vld.sshfl [vmem:[#allocation2] sm:$0xf pattern:$0x76325410]  ;;  %v185_v29 = vcombine.low %v2433_v23, %v2434_v24  ;;  %v184_v33 = vrot.slane %v177_v26, %v2715_v25  ;;  %s2598_s28 = smov 120   ;;  %s2599_s29 = smov 104  }
  0x53   :  { %v2436_v28 = vld.sshfl [vmem:[#allocation2 + $0x2] sm:$0xf pattern:$0x76325410]  ;;  %v2117_v0 = vld [vmem:[%s2955_s4] ss:$0 sm:$0xff] }
  0x54   :  { %2351 = vmatpush3.bf16.msra.mxu1 %v2348_v15  ;;  %v2437_v30 = vld.sshfl [vmem:[#allocation2 + $0x8] sm:$0xf pattern:$0x76325410]  ;;  %v192_v35 = vrot.slane %v185_v29, %v2715_v25  ;;  %v119_v37 = vcombine.low %v2435_v27, %v2436_v28  ;;  %v2125_v5 = vld [vmem:[%s2955_s4 + $0x2] ss:$0 sm:$0xff] }
  0x55   :  { %2343 = vmatpush3.bf16.msra.mxu0 %v2340_v18  ;;  %v2438_v31 = vld.sshfl [vmem:[#allocation2 + $0xa] sm:$0xf pattern:$0x76325410]  ;;  %2245 = vmatprep.subr.mxu1 %v2595_v58  ;;  %s2600_s8 = smov 16   ;;  %s2601_s11 = smov 24  }
  0x56   :  { %v193_v38 = vcombine.low %v184_v33, %v192_v35  ;;  %v194_v39 = vcombine.high %v184_v33, %v192_v35  ;;  %v127_v40 = vcombine.low %v2437_v30, %v2438_v31  ;;  %2353 = vmatprep.subr.bf16.mxu0 %v2352_v36  ;;  %v126_v41 = vrot.slane %v119_v37, %v2715_v25  ;;  %v2439_v48 = vld.sshfl [vmem:[#allocation7] sm:$0xf pattern:$0x76325410]  ;;  %s2602_s0 = smov [#allocation11]  }
  0x57   :  { %v2440_v49 = vld.sshfl [vmem:[#allocation7 + $0x2] sm:$0xf pattern:$0x76325410]  ;;  %vm1585_vm3 = vcmask 130048   ;;  %vm1587_vm4 = vcmask 195584  }
  0x58   :  { %2231 = vmatprep.mubr.msk.f32.mxu1 %vm264_vm0, %v193_v38  ;;  %v134_v42 = vrot.slane %v127_v40, %v2715_v25  ;;  %v2441_v50 = vld.sshfl [vmem:[#allocation7 + $0x8] sm:$0xf pattern:$0x76325410]  ;;  %v235_v52 = vcombine.low %v2439_v48, %v2440_v49  ;;  %s2099_s24 = sshll.u32 %s2602_s0, 4  ;;  %s2100_s24 = int_to_ptr.vmem [resolvable:$true] %s2099_s24 }
  0x59   :  { %2232 = vmatmul.mubr.msk.f32.vlgmr.msra.gmra.mrb[0].mxu1 %vm264_vm0, %v194_v39  ;;  %v2442_v51 = vld.sshfl [vmem:[#allocation7 + $0xa] sm:$0xf pattern:$0x76325410]  ;;  %s2531_s12 = scalar_lea.vmem %s2100_s24, 256  ;;  %p2536_p5 = scmp.lt.s32.totalorder %s2100_s24, %s2100_s24 }
  0x5a   :  { %v135_v45 = vcombine.low %v126_v41, %v134_v42  ;;  %v136_v46 = vcombine.high %v126_v41, %v134_v42  ;;  %v243_v53 = vcombine.low %v2441_v50, %v2442_v51  ;;  %v242_v54 = vrot.slane %v235_v52, %v2715_v25  ;;  %2247 = vmatprep.mubr.msk.f32.mxu1 %vm2596_vm1, %v2595_v58  ;;  %p2532_p4 = scmp.ne.s32.totalorder %s2100_s24, %s2531_s12  ;;  %p2537_p6 = scmp.lt.s32.totalorder %s2531_s12, %s2531_s12 }
  0x5c   :  { %2220 = vmatprep.mubr.msk.f32.mxu0 %vm264_vm0, %v135_v45  ;;  %v250_v55 = vrot.slane %v243_v53, %v2715_v25  ;;  %p2538_p7 = por %p2537_p6, %p2536_p5 }
  0x5d   :  { %2221 = vmatmul.mubr.msk.f32.vlgmr.msra.gmra.mrb[0].mxu0 %vm264_vm0, %v136_v46 }
  0x5e   :  { %2355 = vmatpush3.bf16.msra.mxu0 %v2352_v36  ;;  %v251_v56 = vcombine.low %v242_v54, %v250_v55  ;;  %v252_v57 = vcombine.high %v242_v54, %v250_v55  ;;  %p2539_p8 = pnand %p2538_p7, %p2532_p4 }
  0x5f   :  { %2357 = vmatprep.subr.bf16.mxu0 %v2356_v47 }
  0x60   :  { %2242 = vmatprep.mubr.msk.f32.mxu0 %vm264_vm0, %v251_v56 }
  0x62   :  { %2359 = vmatpush3.bf16.msra.mxu0 %v2356_v47 }
  0x63   :  { %2265 = vmatprep.subr.mxu0 %v2595_v58 }
  0x65   :  { %2243 = vmatmul.mubr.msk.f32.vlgmr.msra.gmra.mrb[2].mxu0 %vm264_vm0, %v252_v57 }
  0x66   :  { %2267 = vmatprep.mubr.msk.f32.mxu0 %vm2596_vm1, %v2595_v58 }
 0x12c   :  { %v2233_v60 = vpop.f32.mrb[0].mxu1 }
 0x12d   :  { %v437_v61 = vadd.f32 %v2233_v60, %v2121_v59  ;;  %v431_v62 = vpop.f32.mrb[1].mxu1 }
 0x12e   :  { %v432_v63 = vadd.f32 %v2121_v59, %v431_v62 }
 0x12f   :  { %2266 = vmatpush3.xpose.msk.msra.mxu0 %vm534_vm2, %v437_v61 }
 0x130   :  { %v2222_v1 = vpop.f32.mrb[0].mxu0  ;;  %691 = vrot.lane.b32.xlu1 %v432_v63, %s2597_s27  ;;  %613 = vrot.lane.b32.xlu0 %v432_v63, %s2598_s28 }
 0x131   :  { %v343_v2 = vadd.f32 %v2222_v1, %v2117_v0  ;;  %v337_v3 = vpop.f32.mrb[1].mxu0  ;;  %2246 = vmatpush3.xpose.msk.msra.mxu1 %vm534_vm2, %v432_v63  ;;  %2275 = vmatprep.subr.mxu0 %v2595_v58 }
 0x132   :  { %v338_v4 = vadd.f32 %v2117_v0, %v337_v3  ;;  %2250 = vmatprep.subr.mxu1 %v2595_v58 }
 0x133   :  { %2268 = vmatmul.mubr.msk.f32.vlgmr.msra.gmra.mrb[4].mxu0 %vm534_vm2, %v343_v2 }
 0x134   :  { %2248 = vmatmul.mubr.msk.f32.vlgmr.msra.gmra.mrb[2].mxu1 %vm534_vm2, %v338_v4  ;;  %689 = vrot.lane.b32.xlu1 %v338_v4, %s2597_s27 }
 0x135   :  { %611 = vrot.lane.b32.xlu0 %v338_v4, %s2598_s28  ;;  %2252 = vmatprep.mubr.msk.f32.mxu1 %vm2596_vm1, %v2595_v58 }
 0x136   :  { %2277 = vmatprep.mubr.msk.f32.mxu0 %vm2596_vm1, %v2595_v58 }
 0x138   :  { %921 = vrot.lane.b32.xlu1 %v343_v2, %s2598_s28  ;;  %v2244_v6 = vpop.f32.mrb[2].mxu0 }
 0x139   :  { %769 = vrot.lane.b32.xlu0 %v432_v63, %s2599_s29  ;;  %v2766_v7 = vadd.f32 %v2244_v6, %v2125_v5  ;;  %v525_v8 = vpop.f32.mrb[3].mxu0 }
 0x13a   :  { %v2790_v20 = vadd.f32 %v2125_v5, %v525_v8 }
 0x13c   :  { %767 = vrot.lane.b32.xlu1 %v338_v4, %s2599_s29 }
 0x13d   :  { %923 = vrot.lane.b32.xlu0 %v437_v61, %s2598_s28 }
 0x140   :  { %1079 = vrot.lane.b32.xlu1 %v437_v61, %s2599_s29 }
 0x141   :  { %1001 = vrot.lane.b32.xlu0 %v437_v61, %s2597_s27 }
 0x144   :  { %1077 = vrot.lane.b32.xlu1 %v343_v2, %s2599_s29 }
 0x145   :  { %999 = vrot.lane.b32.xlu0 %v343_v2, %s2597_s27 }
 0x1a2   :  { %v692_v9 = vpop.permute.xlu1 %691  ;;  %v614_v10 = vpop.permute.xlu0 %613 }
 0x1a3   :  { %2251 = vmatpush3.xpose.msk.msra.mxu1 %vm534_vm2, %v614_v10 }
 0x1a4   :  { %2255 = vmatprep.subr.mxu1 %v2595_v58 }
 0x1a6   :  { %v690_v11 = vpop.permute.xlu1 %689 }
 0x1a7   :  { %v612_v12 = vpop.permute.xlu0 %611 }
 0x1a8   :  { %2253 = vmatmul.mubr.msk.f32.vlgmr.msra.gmra.mrb[4].mxu1 %vm534_vm2, %v612_v12 }
 0x1a9   :  { %2256 = vmatpush3.xpose.msk.msra.mxu1 %vm534_vm2, %v692_v9  ;;  %2257 = vmatprep.mubr.msk.f32.mxu1 %vm2596_vm1, %v2595_v58 }
 0x1aa   :  { %v922_v13 = vpop.permute.xlu1 %921  ;;  %2260 = vmatprep.subr.mxu1 %v2595_v58 }
 0x1ab   :  { %v770_v14 = vpop.permute.xlu0 %769 }
 0x1ac   :  { %2258 = vmatmul.mubr.msk.f32.vlgmr.msra.gmra.mrb[6].mxu1 %vm534_vm2, %v690_v11 }
 0x1ad   :  { %2261 = vmatpush3.xpose.msk.msra.mxu1 %vm534_vm2, %v770_v14  ;;  %2262 = vmatprep.mubr.msk.f32.mxu1 %vm2596_vm1, %v2595_v58 }
 0x1ae   :  { %v768_v15 = vpop.permute.xlu1 %767  ;;  %2270 = vmatprep.subr.mxu1 %v2595_v58 }
 0x1af   :  { %v924_v16 = vpop.permute.xlu0 %923 }
 0x1b0   :  { %2263 = vmatmul.mubr.msk.f32.vlgmr.msra.gmra.mrb[8].mxu1 %vm534_vm2, %v768_v15 }
 0x1b1   :  { %2271 = vmatpush3.xpose.msk.msra.mxu1 %vm534_vm2, %v924_v16  ;;  %2272 = vmatprep.mubr.msk.f32.mxu1 %vm2596_vm1, %v2595_v58 }
 0x1b2   :  { %v1080_v17 = vpop.permute.xlu1 %1079  ;;  %2280 = vmatprep.subr.mxu1 %v2595_v58 }
 0x1b3   :  { %v1002_v18 = vpop.permute.xlu0 %1001 }
 0x1b4   :  { %2273 = vmatmul.mubr.msk.f32.vlgmr.msra.gmra.mrb[10].mxu1 %vm534_vm2, %v922_v13  ;;  %2276 = vmatpush3.xpose.msk.msra.mxu0 %vm534_vm2, %v1002_v18 }
 0x1b5   :  { %2281 = vmatpush3.xpose.msk.msra.mxu1 %vm534_vm2, %v1080_v17  ;;  %2282 = vmatprep.mubr.msk.f32.mxu1 %vm2596_vm1, %v2595_v58 }
 0x1b6   :  { %v1078_v21 = vpop.permute.xlu1 %1077  ;;  %2285 = vmatprep.subr.mxu0 %v2595_v58  ;;  %2290 = vmatprep.subr.mxu1 %v2595_v58 }
 0x1b7   :  { %v1000_v22 = vpop.permute.xlu0 %999 }
 0x1b8   :  { %2278 = vmatmul.mubr.msk.f32.vlgmr.msra.gmra.mrb[6].mxu0 %vm534_vm2, %v1000_v22  ;;  %2283 = vmatmul.mubr.msk.f32.vlgmr.msra.gmra.mrb[12].mxu1 %vm534_vm2, %v1078_v21 }
 0x1b9   :  { %2286 = vmatpush3.msra.mxu0 %v2790_v20  ;;  %2292 = vmatprep.mubr.msk.f32.mxu1 %vm2596_vm1, %v2595_v58 }
 0x1ba   :  { %2287 = vmatprep.mubr.msk.f32.mxu0 %vm2596_vm1, %v2595_v58  ;;  %2295 = vmatprep.subr.mxu0 %v2595_v58 }
 0x206   :  { %v917_v23 = vpop.f32.mrb[4].mxu0 }
 0x207   :  { %v607_v24 = vpop.f32.mrb[2].mxu1  ;;  %v2269_v26 = vpop.f32.mrb[5].mxu0  ;;  %v1167_v34 = vsel %vm534_vm2, %v917_v23, -inf }
 0x208   :  { %v2249_v27 = vpop.f32.mrb[3].mxu1  ;;  %v1155_v28 = vsel %vm534_vm2, %v607_v24, -inf }
 0x209   :  { %1156 = vmax.xlane.f32.xlu0 %v1155_v28 }
 0x27b   :  { %v685_v29 = vpop.f32.mrb[4].mxu1 }
 0x27c   :  { %v2254_v30 = vpop.f32.mrb[5].mxu1  ;;  %v1158_v31 = vsel %vm534_vm2, %v685_v29, -inf }
 0x27d   :  { %1159 = vmax.xlane.f32.xlu1 %v1158_v31 }
 0x27f   :  { %v763_v32 = vpop.f32.mrb[6].mxu1 }
 0x280   :  { %v2259_v33 = vpop.f32.mrb[7].mxu1  ;;  %v1161_v35 = vsel %vm534_vm2, %v763_v32, -inf }
 0x281   :  { %1168 = vmax.xlane.f32.xlu1 %v1167_v34  ;;  %1162 = vmax.xlane.f32.xlu0 %v1161_v35 }
 0x283   :  { %v841_v36 = vpop.f32.mrb[8].mxu1 }
 0x284   :  { %v2264_v37 = vpop.f32.mrb[9].mxu1  ;;  %v1164_v38 = vsel %vm534_vm2, %v841_v36, -inf }
 0x285   :  { %1165 = vmax.xlane.f32.xlu0 %v1164_v38 }
 0x287   :  { %v995_v39 = vpop.f32.mrb[10].mxu1 }
 0x288   :  { %v2274_v40 = vpop.f32.mrb[11].mxu1  ;;  %v1170_v41 = vsel %vm534_vm2, %v995_v39, -inf }
 0x289   :  { %1171 = vmax.xlane.f32.xlu0 %v1170_v41 }
 0x28b   :  { %v1073_v42 = vpop.f32.mrb[6].mxu0  ;;  %v1151_v43 = vpop.f32.mrb[12].mxu1 }
 0x28c   :  { %v2279_v44 = vpop.f32.mrb[7].mxu0  ;;  %v2284_v45 = vpop.f32.mrb[13].mxu1  ;;  %v1173_v46 = vsel %vm534_vm2, %v1073_v42, -inf  ;;  %v1176_v47 = vsel %vm534_vm2, %v1151_v43, -inf }
 0x28d   :  { %1174 = vmax.xlane.f32.xlu1 %v1173_v46  ;;  %1177 = vmax.xlane.f32.xlu0 %v1176_v47 }
 0x296   :  { %v1157_v48 = vpop.xlane.xlu0 %1156 }
 0x297   :  { %v1179_v51 = vsub.f32 %v607_v24, %v1157_v48 }
 0x299   :  { %v1187_v56 = vmul.f32 1.442695, %v1179_v51 }
 0x29e   :  { %1342 = vrot.lane.b32.xlu1 %v2790_v20, %s2598_s28 }
 0x2a3   :  { %1419 = vrot.lane.b32.xlu0 %v2790_v20, %s2597_s27 }
 0x30a   :  { %v1160_v49 = vpop.xlane.xlu1 %1159 }
 0x30b   :  { %v1180_v50 = vsub.f32 %v685_v29, %v1160_v49 }
 0x30d   :  { %v1189_v52 = vmul.f32 1.442695, %v1180_v50 }
 0x30e   :  { %v1169_v53 = vpop.xlane.xlu1 %1168  ;;  %v1163_v54 = vpop.xlane.xlu0 %1162 }
 0x30f   :  { %2399 = vpow2.f32 %v1189_v52  ;;  %v1183_v55 = vsub.f32 %v917_v23, %v1169_v53  ;;  %v1181_v1 = vsub.f32 %v763_v32, %v1163_v54 }
 0x311   :  { %v1195_v57 = vmul.f32 1.442695, %v1183_v55  ;;  %v1191_v10 = vmul.f32 1.442695, %v1181_v1 }
 0x312   :  { %v1166_v59 = vpop.xlane.xlu0 %1165 }
 0x313   :  { %2401 = vpow2.f32 %v1195_v57  ;;  %v1182_v60 = vsub.f32 %v841_v36, %v1166_v59 }
 0x314   :  { %2403 = vpow2.f32 %v1187_v56 }
 0x315   :  { %v1193_v61 = vmul.f32 1.442695, %v1182_v60 }
 0x316   :  { %v1172_v62 = vpop.xlane.xlu0 %1171 }
 0x317   :  { %2405 = vpow2.f32 %v1193_v61  ;;  %v1184_v63 = vsub.f32 %v995_v39, %v1172_v62 }
 0x319   :  { %v2814_v0 = vpop.eup %2399  ;;  %v1197_v2 = vmul.f32 1.442695, %v1184_v63 }
 0x31a   :  { %v1175_v3 = vpop.xlane.xlu1 %1174  ;;  %v1178_v4 = vpop.xlane.xlu0 %1177  ;;  %v1206_v5 = vsel %vm534_vm2, %v2814_v0, 0.0 }
 0x31b   :  { %2407 = vpow2.f32 %v1197_v2  ;;  %v1185_v6 = vsub.f32 %v1073_v42, %v1175_v3  ;;  %v1186_v8 = vsub.f32 %v1151_v43, %v1178_v4  ;;  %1207 = vadd.xlane.f32.xlu0 %v1206_v5 }
 0x31d   :  { %v2818_v9 = vpop.eup %2401  ;;  %v1199_v11 = vmul.f32 1.442695, %v1185_v6  ;;  %v1201_v12 = vmul.f32 1.442695, %v1186_v8 }
 0x31e   :  { %v1343_v13 = vpop.permute.xlu1 %1342  ;;  %v1215_v14 = vsel %vm534_vm2, %v2818_v9, 0.0  ;;  %v2822_v15 = vpop.eup %2403 }
 0x31f   :  { %2409 = vpow2.f32 %v1199_v11  ;;  %1216 = vadd.xlane.f32.xlu1 %v1215_v14  ;;  %2291 = vmatpush3.msra.mxu1 %v1343_v13  ;;  %v1203_v17 = vsel %vm534_vm2, %v2822_v15, 0.0  ;;  %v1420_v30 = vpop.permute.xlu0 %1419 }
 0x320   :  { %2411 = vpow2.f32 %v1201_v12  ;;  %2300 = vmatprep.subr.mxu1 %v2595_v58 }
 0x321   :  { %v2825_v16 = vpop.eup %2405  ;;  %2413 = vpow2.f32 %v1191_v10 }
 0x322   :  { %v1212_v18 = vsel %vm534_vm2, %v2825_v16, 0.0 }
 0x323   :  { %1204 = vadd.xlane.f32.xlu1 %v1203_v17  ;;  %1213 = vadd.xlane.f32.xlu0 %v1212_v18 }
 0x325   :  { %v2831_v21 = vpop.eup %2407 }
 0x326   :  { %v1218_v22 = vsel %vm534_vm2, %v2831_v21, 0.0 }
 0x327   :  { %1219 = vadd.xlane.f32.xlu0 %v1218_v22 }
 0x329   :  { %v2835_v23 = vpop.eup %2409 }
 0x32a   :  { %v2837_v24 = vpop.eup %2411  ;;  %v1221_v26 = vsel %vm534_vm2, %v2835_v23, 0.0 }
 0x32b   :  { %v2841_v27 = vpop.eup %2413  ;;  %1222 = vadd.xlane.f32.xlu1 %v1221_v26  ;;  %v1224_v28 = vsel %vm534_vm2, %v2837_v24, 0.0 }
 0x32c   :  { %1225 = vadd.xlane.f32.xlu0 %v1224_v28  ;;  %v1209_v29 = vsel %vm534_vm2, %v2841_v27, 0.0 }
 0x32f   :  { %1210 = vadd.xlane.f32.xlu1 %v1209_v29 }
 0x340   :  { %1496 = vrot.lane.b32.xlu1 %v2790_v20, %s2599_s29 }
 0x342   :  { %1742 = vrot.lane.b32.xlu0 %v2766_v7, %s2597_s27 }
 0x344   :  { %1665 = vrot.lane.b32.xlu1 %v2766_v7, %s2598_s28 }
 0x348   :  { %1819 = vrot.lane.b32.xlu1 %v2766_v7, %s2599_s29 }
 0x3a8   :  { %v1208_v31 = vpop.xlane.xlu0 %1207 }
 0x3a9   :  { %2415 = vrcp.f32 %v1208_v31 }
 0x3ac   :  { %v1217_v32 = vpop.xlane.xlu1 %1216 }
 0x3ad   :  { %2417 = vrcp.f32 %v1217_v32 }
 0x3b0   :  { %v1205_v33 = vpop.xlane.xlu1 %1204  ;;  %v1214_v34 = vpop.xlane.xlu0 %1213 }
 0x3b1   :  { %2419 = vrcp.f32 %v1205_v33 }
 0x3b2   :  { %2421 = vrcp.f32 %v1214_v34 }
 0x3b3   :  { %v2416_v35 = vpop.eup %2415 }
 0x3b4   :  { %v1236_v20 = vmul.f32 %v2416_v35, %v1208_v31  ;;  %v1220_v36 = vpop.xlane.xlu0 %1219 }
 0x3b5   :  { %2423 = vrcp.f32 %v1220_v36 }
 0x3b6   :  { %v1244_v37 = vsub.f32 2.0, %v1236_v20 }
 0x3b7   :  { %v2418_v40 = vpop.eup %2417 }
 0x3b8   :  { %v1252_v38 = vmul.f32 %v2416_v35, %v1244_v37  ;;  %v1223_v39 = vpop.xlane.xlu1 %1222  ;;  %v1239_v45 = vmul.f32 %v2418_v40, %v1217_v32 }
 0x3b9   :  { %2425 = vrcp.f32 %v1223_v39  ;;  %v1226_v41 = vpop.xlane.xlu0 %1225 }
 0x3ba   :  { %v1260_v42 = vmul.f32 %v2814_v0, %v1252_v38  ;;  %2427 = vrcp.f32 %v1226_v41  ;;  %v1247_v52 = vsub.f32 2.0, %v1239_v45  ;;  %v1914_v38 = vld [vmem:[#allocation8 + $0x70] sm:$0xff] }
 0x3bb   :  { %v2420_v43 = vpop.eup %2419 }
 0x3bc   :  { %v2422_v44 = vpop.eup %2421  ;;  %v1235_v46 = vmul.f32 %v2420_v43, %v1205_v33  ;;  %v1211_v47 = vpop.xlane.xlu1 %1210  ;;  %2293 = vmatmul.mubr.msk.f32.vlgmr.msra.gmra.mrb[14].mxu1 %vm534_vm2, %v1260_v42  ;;  %v1255_v63 = vmul.f32 %v2418_v40, %v1247_v52  ;;  %v1912_v33 = vld [vmem:[#allocation8 + $0x60] sm:$0xff] }
 0x3bd   :  { %v1238_v48 = vmul.f32 %v2422_v44, %v1214_v34  ;;  %2429 = vrcp.f32 %v1211_v47  ;;  %2302 = vmatprep.mubr.msk.f32.mxu1 %vm2596_vm1, %v2595_v58  ;;  %v1913_v34 = vld [vmem:[#allocation8 + $0x68] sm:$0xff] }
 0x3be   :  { %v1243_v49 = vsub.f32 2.0, %v1235_v46  ;;  %v1263_v10 = vmul.f32 %v2818_v9, %v1255_v63 }
 0x3bf   :  { %v2424_v50 = vpop.eup %2423  ;;  %v1246_v51 = vsub.f32 2.0, %v1238_v48 }
 0x3c0   :  { %v1251_v53 = vmul.f32 %v2420_v43, %v1243_v49  ;;  %v1240_v54 = vmul.f32 %v2424_v50, %v1220_v36  ;;  %v1497_v55 = vpop.permute.xlu1 %1496  ;;  %v2360_v36 = vpack.c.bf16 %v1913_v34, %v1912_v33 }
 0x3c1   :  { %v1254_v56 = vmul.f32 %v2422_v44, %v1246_v51  ;;  %2301 = vmatpush3.msra.mxu1 %v1497_v55 }
 0x3c2   :  { %v1259_v57 = vmul.f32 %v2822_v15, %v1251_v53  ;;  %v1248_v59 = vsub.f32 2.0, %v1240_v54  ;;  %2310 = vmatprep.subr.mxu1 %v2595_v58 }
 0x3c3   :  { %v2426_v60 = vpop.eup %2425  ;;  %v1262_v61 = vmul.f32 %v2825_v16, %v1254_v56 }
 0x3c4   :  { %v2428_v62 = vpop.eup %2427  ;;  %v1256_v0 = vmul.f32 %v2424_v50, %v1248_v59  ;;  %v1241_v1 = vmul.f32 %v2426_v60, %v1223_v39  ;;  %2288 = vmatmul.mubr.msk.f32.vlgmr.msra.gmra.mrb[8].mxu0 %vm534_vm2, %v1259_v57  ;;  %v1666_v2 = vpop.permute.xlu1 %1665  ;;  %v1340_v22 = vadd.f32 %v1260_v42, %v1259_v57  ;;  %v1915_v39 = vld [vmem:[#allocation8 + $0x78] sm:$0xff] }
 0x3c5   :  { %v1242_v3 = vmul.f32 %v2428_v62, %v1226_v41  ;;  %2296 = vmatpush3.msra.mxu0 %v1420_v30  ;;  %2303 = vmatmul.mubr.msk.f32.vlgmr.msra.gmra.mrb[16].mxu1 %vm534_vm2, %v1262_v61  ;;  %v2364_v41 = vpack.c.bf16 %v1915_v39, %v1914_v38 }
 0x3c6   :  { %v1264_v4 = vmul.f32 %v2831_v21, %v1256_v0  ;;  %v1249_v5 = vsub.f32 2.0, %v1241_v1  ;;  %2311 = vmatpush3.msra.mxu1 %v1666_v2  ;;  %2312 = vmatprep.mubr.msk.f32.mxu1 %vm2596_vm1, %v2595_v58 }
 0x3c7   :  { %v2430_v6 = vpop.eup %2429  ;;  %v1250_v8 = vsub.f32 2.0, %v1242_v3  ;;  %2320 = vmatprep.subr.mxu1 %v2595_v58  ;;  %2297 = vmatprep.mubr.msk.f32.mxu0 %vm2596_vm1, %v2595_v58 }
 0x3c8   :  { %v1257_v11 = vmul.f32 %v2426_v60, %v1249_v5  ;;  %v1237_v12 = vmul.f32 %v2430_v6, %v1211_v47  ;;  %v1820_v13 = vpop.permute.xlu1 %1819  ;;  %2305 = vmatprep.subr.mxu0 %v2595_v58  ;;  %v1663_v15 = vadd.f32 %v1264_v4, %v1263_v10 }
 0x3c9   :  { %v1258_v14 = vmul.f32 %v2428_v62, %v1250_v8  ;;  %2313 = vmatmul.mubr.msk.f32.vlgmr.msra.gmra.mrb[18].mxu1 %vm534_vm2, %v1264_v4 }
 0x3ca   :  { %v1265_v16 = vmul.f32 %v2835_v23, %v1257_v11  ;;  %v1245_v17 = vsub.f32 2.0, %v1237_v12  ;;  %2321 = vmatpush3.msra.mxu1 %v1820_v13  ;;  %2322 = vmatprep.mubr.msk.f32.mxu1 %vm2596_vm1, %v2595_v58 }
 0x3cb   :  { %v1266_v18 = vmul.f32 %v2837_v24, %v1258_v14  ;;  %v1743_v24 = vpop.permute.xlu0 %1742 }
 0x3cc   :  { %v1741_v21 = vadd.f32 %v1663_v15, %v1265_v16  ;;  %v1253_v9 = vmul.f32 %v2430_v6, %v1245_v17 }
 0x3cd   :  { %2323 = vmatmul.mubr.msk.f32.vlgmr.msra.gmra.mrb[20].mxu1 %vm534_vm2, %v1266_v18 }
 0x3ce   :  { %v1818_v26 = vadd.f32 %v1741_v21, %v1266_v18  ;;  %v1261_v28 = vmul.f32 %v2841_v27, %v1253_v9 }
 0x3d0   :  { %v1418_v29 = vadd.f32 %v1340_v22, %v1261_v28  ;;  %2298 = vmatmul.mubr.msk.f32.vlgmr.msra.gmra.mrb[10].mxu0 %vm534_vm2, %v1261_v28  ;;  %v1910_v30 = vmul.f32 0.25, %v1818_v26 }
 0x3d1   :  { %2306 = vmatpush3.msra.mxu0 %v2766_v7  ;;  %2307 = vmatprep.mubr.msk.f32.mxu0 %vm2596_vm1, %v2595_v58 }
 0x3d2   :  { %2315 = vmatprep.subr.mxu0 %v2595_v58  ;;  %v1495_v23 = vadd.f32 %v1418_v29, %v1262_v61  ;;  %2081 = vst.msk [vmem:[#allocation11 + $0x8] sm:$0xff] %vm534_vm2, %v1910_v30 }
 0x3d4   :  { %2308 = vmatmul.mubr.msk.f32.vlgmr.msra.gmra.mrb[12].mxu0 %vm534_vm2, %v1263_v10  ;;  %v1589_v31 = vmul.f32 0.25, %v1495_v23 }
 0x3d5   :  { %2316 = vmatpush3.msra.mxu0 %v1743_v24  ;;  %2317 = vmatprep.mubr.msk.f32.mxu0 %vm2596_vm1, %v2595_v58 }
 0x3d6   :  { %2080 = vst.msk [vmem:[#allocation11] sm:$0xff] %vm534_vm2, %v1589_v31  ;;  %2361 = vmatprep.subr.bf16.mxu0 %v2360_v36 }
 0x3d8   :  { %2318 = vmatmul.mubr.msk.f32.vlgmr.msra.gmra.mrb[14].mxu0 %vm534_vm2, %v1265_v16 }
 0x3d9   :  { %2363 = vmatpush3.bf16.msra.mxu0 %v2360_v36 }
 0x3da   :  { %2365 = vmatprep.subr.bf16.mxu0 %v2364_v41 }
 0x3dd   :  { %2367 = vmatpush3.bf16.msra.mxu0 %v2364_v41 }
 0x48f   :  { %v1414_v7 = vpop.f32.mrb[14].mxu1 }
 0x490   :  { %1573 = vrot.lane.b32.xlu0 %v1414_v7, %s2592_s1  ;;  %v2294_v27 = vpop.f32.mrb[15].mxu1 }
 0x497   :  { %v1336_v32 = vpop.f32.mrb[8].mxu0 }
 0x498   :  { %v1568_v35 = vpop.f32.mrb[16].mxu1  ;;  %v2289_v20 = vpop.f32.mrb[9].mxu0 }
 0x499   :  { %v2304_v37 = vpop.f32.mrb[17].mxu1 }
 0x49c   :  { %v1737_v40 = vpop.f32.mrb[18].mxu1 }
 0x49d   :  { %1896 = vrot.lane.b32.xlu0 %v1737_v40, %s2592_s1  ;;  %v2314_v42 = vpop.f32.mrb[19].mxu1 }
 0x4a0   :  { %v1891_v43 = vpop.f32.mrb[20].mxu1 }
 0x4a1   :  { %v2324_v44 = vpop.f32.mrb[21].mxu1 }
 0x4a3   :  { %v1491_v45 = vpop.f32.mrb[10].mxu0 }
 0x4a4   :  { %1577 = vrot.lane.b32.xlu1 %v1491_v45, %s2600_s8  ;;  %v2299_v46 = vpop.f32.mrb[11].mxu0 }
 0x4a7   :  { %v1659_v47 = vpop.f32.mrb[12].mxu0 }
 0x4a8   :  { %v2309_v48 = vpop.f32.mrb[13].mxu0  ;;  %1581 = vrot.lane.b32.xlu1 %v1568_v35, %s2601_s11 }
 0x4ab   :  { %v1814_v49 = vpop.f32.mrb[14].mxu0 }
 0x4ac   :  { %v2319_v50 = vpop.f32.mrb[15].mxu0  ;;  %1900 = vrot.lane.b32.xlu0 %v1814_v49, %s2600_s8  ;;  %1904 = vrot.lane.b32.xlu1 %v1891_v43, %s2601_s11 }
 0x502   :  { %v1574_v51 = vpop.permute.xlu0 %1573 }
 0x503   :  { %v1584_v53 = vsel %vm534_vm2, %v1336_v32, %v1574_v51 }
 0x50f   :  { %v1897_v54 = vpop.permute.xlu0 %1896 }
 0x510   :  { %v1907_v59 = vsel %vm534_vm2, %v1659_v47, %v1897_v54 }
 0x516   :  { %v1578_v52 = vpop.permute.xlu1 %1577 }
 0x517   :  { %v1586_v55 = vsel %vm1585_vm3, %v1584_v53, %v1578_v52 }
 0x51a   :  { %v1582_v56 = vpop.permute.xlu1 %1581 }
 0x51b   :  { %v1588_v57 = vsel %vm1587_vm4, %v1586_v55, %v1582_v56 }
 0x51c   :  { %2333 = vmatprep.mubr.msk.f32.mxu0 %vm264_vm0, %v1588_v57 }
 0x51e   :  { %v1901_v60 = vpop.permute.xlu0 %1900  ;;  %v1905_v61 = vpop.permute.xlu1 %1904 }
 0x51f   :  { %v1908_v62 = vsel %vm1585_vm3, %v1907_v59, %v1901_v60 }
 0x520   :  { %v1909_v63 = vsel %vm1587_vm4, %v1908_v62, %v1905_v61 }
 0x521   :  { %2334 = vmatmul.mubr.msk.f32.vlgmr.msra.gmra.mrb[16].mxu0 %vm264_vm0, %v1909_v63 }
 0x522   :  { %2542 = shalt.err (!%p2539_p8)
}
 0x523   :  { %s2543_s15 = scalar_lea.hbm %s2957_s6, 256 }
 0x524   :  { %p2544_p9 = scmp.ne.s32.totalorder %s2957_s6, %s2543_s15  ;;  %p2547_p10 = scmp.lt.u32.totalorder %s2543_s15, %s2957_s6 }
 0x526   :  { %p2549_p11 = pnand %p2547_p10, %p2544_p9 }
 0x528   :  { %2552 = shalt.err (!%p2549_p11)
}
 0x529   :  { %2105 = dma.vmem_to_hbm [thread:$0]  %s2100_s24, 256, %s2957_s6, [#allocation12], %s2591_s2, %s2591_s2, %s2592_s1   ;;  %vm2071_vm5 = vcmask 254976  }
 0x52a   :  { %v2153_v0 = vld [vmem:[%s2955_s4 + $0x3] ss:$0 sm:$0xff]  ;;  %s2603_s4 = smov [#allocation10]  }
 0x52b   :  { %s2087_s6 = sshll.u32 %s2603_s4, 4  ;;  %s2088_s6 = int_to_ptr.vmem [resolvable:$true] %s2087_s6 }
 0x52c   :  { %s2553_s2 = scalar_lea.vmem %s2088_s6, 256  ;;  %p2558_p13 = scmp.lt.s32.totalorder %s2088_s6, %s2088_s6 }
 0x52d   :  { %p2554_p12 = scmp.ne.s32.totalorder %s2088_s6, %s2553_s2  ;;  %p2559_p0 = scmp.lt.s32.totalorder %s2553_s2, %s2553_s2 }
 0x52f   :  { %p2560_p1 = por %p2559_p0, %p2558_p13 }
 0x531   :  { %p2561_p2 = pnand %p2560_p1, %p2554_p12 }
 0x5f4   :  { %v2335_v1 = vpop.f32.mrb[16].mxu0 }
 0x5f5   :  { %v2002_v2 = vadd.f32 %v2335_v1, %v2153_v0  ;;  %v1996_v3 = vpop.f32.mrb[17].mxu0 }
 0x5f6   :  { %v1997_v4 = vadd.f32 %v2153_v0, %v1996_v3 }
 0x5f7   :  { %v2020_v5 = vcombine.high %v2002_v2, %v2595_v58  ;;  %v2027_v6 = vrot.slane %v2002_v2, %v2713_v19 }
 0x5f8   :  { %v2005_v8 = vcombine.high %v1997_v4, %v2595_v58  ;;  %v2012_v10 = vrot.slane %v1997_v4, %v2713_v19 }
 0x5f9   :  { %v2034_v11 = vrot.slane %v2020_v5, %v2713_v19 }
 0x5fa   :  { %v2019_v12 = vrot.slane %v2005_v8, %v2713_v19  ;;  %v2035_v13 = vcombine.low %v2012_v10, %v2027_v6  ;;  %v2036_v14 = vcombine.high %v2012_v10, %v2027_v6 }
 0x5fc   :  { %v2043_v15 = vrot.slane %v2035_v13, %v2715_v25  ;;  %v2050_v16 = vrot.slane %v2036_v14, %v2715_v25  ;;  %v2051_v17 = vcombine.low %v2019_v12, %v2034_v11  ;;  %v2052_v18 = vcombine.high %v2019_v12, %v2034_v11 }
 0x5fe   :  { %v2059_v21 = vrot.slane %v2051_v17, %v2715_v25  ;;  %v2066_v9 = vrot.slane %v2052_v18, %v2715_v25  ;;  %v2067_v22 = vcombine.high %v2043_v15, %v2595_v58  ;;  %v2068_v26 = vcombine.high %v2050_v16, %v2595_v58  ;;  %2072 = vst.msk [vmem:[#allocation10] sm:$0x3] %vm2071_vm5, %v2043_v15 }
 0x5ff   :  { %2074 = vst.msk [vmem:[#allocation10 + $0x4] sm:$0x3] %vm2071_vm5, %v2050_v16 }
 0x600   :  { %v2069_v19 = vcombine.high %v2059_v21, %v2595_v58  ;;  %v2070_v28 = vcombine.high %v2066_v9, %v2595_v58  ;;  %2073 = vst.msk [vmem:[#allocation10 + $0x2] sm:$0x3] %vm2071_vm5, %v2067_v22  ;;  %2075 = vst.msk [vmem:[#allocation10 + $0x6] sm:$0x3] %vm2071_vm5, %v2068_v26 }
 0x601   :  { %2076 = vst.msk [vmem:[#allocation10 + $0x8] sm:$0x3] %vm2071_vm5, %v2059_v21  ;;  %2078 = vst.msk [vmem:[#allocation10 + $0xc] sm:$0x3] %vm2071_vm5, %v2066_v9 }
 0x602   :  { %2077 = vst.msk [vmem:[#allocation10 + $0xa] sm:$0x3] %vm2071_vm5, %v2069_v19  ;;  %2079 = vst.msk [vmem:[#allocation10 + $0xe] sm:$0x3] %vm2071_vm5, %v2070_v28 }
 0x603   :  { %2564 = shalt.err (!%p2561_p2)
}
 0x604   :  { %s2565_s25 = scalar_lea.hbm %s2956_s5, 256 }
 0x605   :  { %p2566_p3 = scmp.ne.s32.totalorder %s2956_s5, %s2565_s25  ;;  %p2569_p4 = scmp.lt.u32.totalorder %s2565_s25, %s2956_s5 }
 0x607   :  { %p2571_p5 = pnand %p2569_p4, %p2566_p3 }
 0x609   :  { %2574 = shalt.err (!%p2571_p5)
}
 0x60a   :  { %2093 = dma.vmem_to_hbm [thread:$0]  %s2088_s6, 256, %s2956_s5, [#allocation4], %s2587_s9, %s2587_s9, %s2588_s10  }
 0x60b   :  { %2581 = dma.done.wait [#allocation4], 256  }
 0x60c   :  { %2582 = vsyncadd [#allocation4], 4294967040 }
 0x60d   :  { %2583 = dma.done.wait [#allocation12], 256  }
 0x60e   :  { %2584 = vsyncadd [#allocation12], 4294967040 }
 0x60f   :  { %2112 = vsyncpa [#allocation3], 1 }
 0x610   :  { %2113 = vsyncpa [#allocation6], 1 }
 0x611   :  { %2114 = vsyncpa [#allocation9], 1 }
 0x612   :  { %2115 = vsyncpa [#allocation4], 1 }
 0x613   :  { %2116 = vsyncpa [#allocation12], 1 }

</bundles_post_ra>
